<compile_context>
chip_gen: v6e
topology: v6e:2x2x1
jax: 0.10.0
libtpu: 0.0.40
codegen_flags: <defaults>
</compile_context>

<pallas_src>
import jax
import jax.numpy as jnp
from jax.experimental import pallas as pl
from jax.experimental.pallas import tpu as pltpu

HID = 256


def policy_kernel(agent_ref, nbr_ref, nn_ref,
                  w1_ref, b1_ref, w2_ref, b2_ref, w3_ref, b3_ref,
                  wa_ref, ba_ref, w4_ref, b4_ref, w5_ref, b5_ref,
                  out_ref):
    TB = agent_ref.shape[0]          # batch rows in this tile
    TBN = nbr_ref.shape[0]           # TB * N neighbor rows in this tile
    N = TBN // TB                    # neighbors per batch element (static)

    # ---- neighbor_embedding: Linear -> ReLU -> Linear -> ReLU -> Linear ----
    # bf16 MXU operands, f32 accumulation; bias-add / ReLU in f32.
    h = jnp.dot(nbr_ref[...].astype(jnp.bfloat16), w1_ref[...],
                preferred_element_type=jnp.float32) + b1_ref[...]
    h = jnp.maximum(h, 0.0)
    h = jnp.dot(h.astype(jnp.bfloat16), w2_ref[...],
                preferred_element_type=jnp.float32) + b2_ref[...]
    h = jnp.maximum(h, 0.0)
    h = jnp.dot(h.astype(jnp.bfloat16), w3_ref[...],
                preferred_element_type=jnp.float32) + b3_ref[...]   # (TB*N, 256)

    # ---- masked sum over the neighbor axis: per-tile block-diag mask matmul --
    # mask[r, j] = 1 iff neighbor row j belongs to local batch r and its local
    # index (j - r*N) is < n_neighbors[r].  No div/mod: local = col - row*N.
    row = jax.lax.broadcasted_iota(jnp.int32, (TB, TBN), 0)
    col = jax.lax.broadcasted_iota(jnp.int32, (TB, TBN), 1)
    local = col - row * N
    valid = (local >= 0) & (local < N) & (local < nn_ref[...])      # nn_ref (TB,1)
    mask = valid.astype(jnp.float32)
    # Exact masked sum (0/1 mask, f32 operands); tiny matmul so f32 is cheap.
    x = jnp.dot(mask, h, preferred_element_type=jnp.float32)        # (TB, 256)

    # ---- + agent_embedding: Linear(agent_dim, 256) ----
    x = x + jnp.dot(agent_ref[...].astype(jnp.bfloat16), wa_ref[...],
                    preferred_element_type=jnp.float32) + ba_ref[...]

    # ---- model: ReLU -> Linear(256,256) -> ReLU -> Linear(256,out_pad) ----
    x = jnp.maximum(x, 0.0)
    x = jnp.dot(x.astype(jnp.bfloat16), w4_ref[...],
                preferred_element_type=jnp.float32) + b4_ref[...]
    x = jnp.maximum(x, 0.0)
    out_ref[...] = jnp.dot(x.astype(jnp.bfloat16), w5_ref[...],
                           preferred_element_type=jnp.float32) + b5_ref[...]


def _choose_tb(B, N):
    """Largest batch tile with 8-aligned blocks, preferring >= 256 matmul rows
    while keeping the (tb*N, 256) f32 intermediate under ~8 MiB."""
    max_rows = (8 << 20) // (HID * 4)
    best = None
    for tb in range(1, B + 1):
        if B % tb:
            continue
        if tb != B and tb % 8:
            continue                      # keep sublane-aligned block shapes
        rows = tb * N
        if rows > max_rows and best is not None:
            break
        best = tb
        if rows >= 256:
            break                         # enough rows to fill the MXU
    return best if best is not None else B


def policy_forward(agent, neighbors, n_neighbors, params, tb=None):
    """agent: (B, Da) f32; neighbors: (B, N, Dn) f32; n_neighbors: (B,) int."""
    B, N, Dn = neighbors.shape
    Da = agent.shape[1]
    assert agent.shape[0] == B and n_neighbors.shape[0] == B

    if tb is None:
        tb = _choose_tb(B, N)
    assert B % tb == 0, "batch tile must divide B"

    nbr_flat = neighbors.reshape(B * N, Dn)            # row-major (b, n) flatten
    nn_col = n_neighbors.astype(jnp.int32).reshape(B, 1)

    out_dim = params["w5"].shape[1]
    out_pad = ((out_dim + 127) // 128) * 128           # lane-dense output slab

    bf = jnp.bfloat16
    w1, w2, w3 = params["w1"].astype(bf), params["w2"].astype(bf), params["w3"].astype(bf)
    wa, w4 = params["wa"].astype(bf), params["w4"].astype(bf)
    b1, b2, b3 = params["b1"], params["b2"], params["b3"]
    ba, b4 = params["ba"], params["b4"]
    w5p = jnp.zeros((HID, out_pad), bf).at[:, :out_dim].set(params["w5"].astype(bf))
    b5p = jnp.zeros((1, out_pad), jnp.float32).at[:, :out_dim].set(params["b5"])

    def resident(shape):   # weights/biases: same block every step -> no re-DMA
        return pl.BlockSpec(shape, lambda i: (0, 0))

    in_specs = [
        pl.BlockSpec((tb, Da), lambda i: (i, 0)),        # agent tile
        pl.BlockSpec((tb * N, Dn), lambda i: (i, 0)),    # neighbor rows tile
        pl.BlockSpec((tb, 1), lambda i: (i, 0)),         # n_neighbors tile
        resident(w1.shape), resident(b1.shape),
        resident(w2.shape), resident(b2.shape),
        resident(w3.shape), resident(b3.shape),
        resident(wa.shape), resident(ba.shape),
        resident(w4.shape), resident(b4.shape),
        resident(w5p.shape), resident(b5p.shape),
    ]
    out_specs = pl.BlockSpec((tb, out_pad), lambda i: (i, 0))

    out_padded = pl.pallas_call(
        policy_kernel,
        out_shape=jax.ShapeDtypeStruct((B, out_pad), jnp.float32),
        grid=(B // tb,),
        in_specs=in_specs,
        out_specs=out_specs,
        compiler_params=pltpu.CompilerParams(
            dimension_semantics=("parallel",),           # v7x: shard across 2 TCs
            vmem_limit_bytes=48 * 1024 * 1024,           # headroom under v7x's 64 MiB
        ),
    )(agent, nbr_flat, nn_col,
      w1, b1, w2, b2, w3, b3, wa, ba, w4, b4, w5p, b5p)

    return out_padded[:, :out_dim]


def make_params(key, agent_dim, neighbor_dim, out_dim):
    ks = jax.random.split(key, 6)

    def lin(k, fan_in, fan_out):
        w = jax.random.normal(k, (fan_in, fan_out), jnp.float32) / jnp.sqrt(
            jnp.float32(fan_in))
        b = jnp.full((1, fan_out), 0.01, jnp.float32)
        return w, b

    w1, b1 = lin(ks[0], neighbor_dim, HID)
    w2, b2 = lin(ks[1], HID, HID)
    w3, b3 = lin(ks[2], HID, HID)
    wa, ba = lin(ks[3], agent_dim, HID)
    w4, b4 = lin(ks[4], HID, HID)
    w5, b5 = lin(ks[5], HID, out_dim)
    return dict(w1=w1, b1=b1, w2=w2, b2=b2, w3=w3, b3=b3,
                wa=wa, ba=ba, w4=w4, b4=b4, w5=w5, b5=b5)


def policy_reference(agent, neighbors, n_neighbors, params):
    """Pure-JAX f32 reference mirroring the PyTorch forward."""
    h = jnp.maximum(neighbors @ params["w1"] + params["b1"], 0.0)
    h = jnp.maximum(h @ params["w2"] + params["b2"], 0.0)
    h = h @ params["w3"] + params["b3"]                         # (B, N, 256)
    seq_mask = (jnp.arange(neighbors.shape[1])[None, :]
                < n_neighbors[:, None]).astype(h.dtype)
    x = jnp.sum(h * seq_mask[:, :, None], axis=1)
    x = x + agent @ params["wa"] + params["ba"]
    x = jnp.maximum(x, 0.0)
    x = jnp.maximum(x @ params["w4"] + params["b4"], 0.0)
    return x @ params["w5"] + params["b5"]


# TODO(synk): the ragged Sequence[Tensor]-neighbors branch and the unbatched
# (agent.ndim == 1) branch of Policy.embedding are not implemented here; only
# the batched dense-tensor + n_neighbors-mask path is kernelized.

if __name__ == "__main__":
    agent_dim, neighbor_dim, out_dim = 16, 16, 8
    B, N = 8, 8

    key = jax.random.PRNGKey(0)
    kp, ka, kn, kc = jax.random.split(key, 4)

    params = make_params(kp, agent_dim, neighbor_dim, out_dim)
    agent = jax.random.normal(ka, (B, agent_dim), jnp.float32)
    neighbors = jax.random.normal(kn, (B, N, neighbor_dim), jnp.float32)
    n_neighbors = jax.random.randint(kc, (B,), 1, N + 1, jnp.int32)

    out = policy_forward(agent, neighbors, n_neighbors, params)
    out = jax.block_until_ready(out)

    ref = policy_reference(agent, neighbors, n_neighbors, params)
    assert out.shape == (B, out_dim)
    # bf16 MXU operands vs f32 reference -> loosened tolerance.
    assert jnp.allclose(out, ref, atol=5e-2, rtol=5e-2), "mismatch vs reference"

    print("KERNEL_OK")
</pallas_src>

<mosaic_0001>
module attributes {stable_mosaic.version = 11 : i64} {
  func.func @policy_kernel(%arg0: i32, %arg1: memref<8x16xf32, #tpu.memory_space<vmem>>, %arg2: memref<64x16xf32, #tpu.memory_space<vmem>>, %arg3: memref<8x1xi32, #tpu.memory_space<vmem>>, %arg4: memref<16x256xbf16, #tpu.memory_space<vmem>>, %arg5: memref<1x256xf32, #tpu.memory_space<vmem>>, %arg6: memref<256x256xbf16, #tpu.memory_space<vmem>>, %arg7: memref<1x256xf32, #tpu.memory_space<vmem>>, %arg8: memref<256x256xbf16, #tpu.memory_space<vmem>>, %arg9: memref<1x256xf32, #tpu.memory_space<vmem>>, %arg10: memref<16x256xbf16, #tpu.memory_space<vmem>>, %arg11: memref<1x256xf32, #tpu.memory_space<vmem>>, %arg12: memref<256x256xbf16, #tpu.memory_space<vmem>>, %arg13: memref<1x256xf32, #tpu.memory_space<vmem>>, %arg14: memref<256x128xbf16, #tpu.memory_space<vmem>>, %arg15: memref<1x128xf32, #tpu.memory_space<vmem>>, %arg16: memref<8x128xf32, #tpu.memory_space<vmem>>) attributes {dimension_semantics = [#tpu.dimension_semantics<parallel>], iteration_bounds = array<i64: 1>, scalar_prefetch = 0 : i64, scratch_operands = 0 : i64, tpu.core_type = #tpu.core_type<tc>, window_params = [{transform_indices = @transform_0, window_bounds = array<i64: 8, 16>}, {transform_indices = @transform_1, window_bounds = array<i64: 64, 16>}, {transform_indices = @transform_2, window_bounds = array<i64: 8, 1>}, {pipeline_mode = #tpu.pipeline_mode<synchronous>, transform_indices = @transform_3, window_bounds = array<i64: 16, 256>}, {pipeline_mode = #tpu.pipeline_mode<synchronous>, transform_indices = @transform_4, window_bounds = array<i64: 1, 256>}, {pipeline_mode = #tpu.pipeline_mode<synchronous>, transform_indices = @transform_5, window_bounds = array<i64: 256, 256>}, {pipeline_mode = #tpu.pipeline_mode<synchronous>, transform_indices = @transform_6, window_bounds = array<i64: 1, 256>}, {pipeline_mode = #tpu.pipeline_mode<synchronous>, transform_indices = @transform_7, window_bounds = array<i64: 256, 256>}, {pipeline_mode = #tpu.pipeline_mode<synchronous>, transform_indices = @transform_8, window_bounds = array<i64: 1, 256>}, {pipeline_mode = #tpu.pipeline_mode<synchronous>, transform_indices = @transform_9, window_bounds = array<i64: 16, 256>}, {pipeline_mode = #tpu.pipeline_mode<synchronous>, transform_indices = @transform_10, window_bounds = array<i64: 1, 256>}, {pipeline_mode = #tpu.pipeline_mode<synchronous>, transform_indices = @transform_11, window_bounds = array<i64: 256, 256>}, {pipeline_mode = #tpu.pipeline_mode<synchronous>, transform_indices = @transform_12, window_bounds = array<i64: 1, 256>}, {pipeline_mode = #tpu.pipeline_mode<synchronous>, transform_indices = @transform_13, window_bounds = array<i64: 256, 128>}, {pipeline_mode = #tpu.pipeline_mode<synchronous>, transform_indices = @transform_14, window_bounds = array<i64: 1, 128>}, {transform_indices = @transform_15, window_bounds = array<i64: 8, 128>}]} {
    %c0 = arith.constant 0 : index
    %c0_0 = arith.constant 0 : index
    %0 = vector.load %arg2[%c0, %c0_0] : memref<64x16xf32, #tpu.memory_space<vmem>>, vector<64x16xf32>
    %1 = arith.truncf %0 : vector<64x16xf32> to vector<64x16xbf16>
    %c0_1 = arith.constant 0 : index
    %c0_2 = arith.constant 0 : index
    %2 = vector.load %arg4[%c0_1, %c0_2] : memref<16x256xbf16, #tpu.memory_space<vmem>>, vector<16x256xbf16>
    %cst = arith.constant dense<0.000000e+00> : vector<64x256xf32>
    %3 = tpu.matmul %1, %2, %cst {dimension_numbers = #tpu.dot_dimension_numbers<[1], [0], [0], [1], [0, 0, 1, 1], [], []>} : vector<64x16xbf16>, vector<16x256xbf16>, vector<64x256xf32> -> vector<64x256xf32>
    %c0_3 = arith.constant 0 : index
    %c0_4 = arith.constant 0 : index
    %4 = vector.load %arg5[%c0_3, %c0_4] : memref<1x256xf32, #tpu.memory_space<vmem>>, vector<1x256xf32>
    %5 = vector.broadcast %4 : vector<1x256xf32> to vector<64x256xf32>
    %6 = arith.addf %3, %5 : vector<64x256xf32>
    %cst_5 = arith.constant 0.000000e+00 : f32
    %7 = vector.broadcast %cst_5 : f32 to vector<64x256xf32>
    %8 = arith.maximumf %6, %7 : vector<64x256xf32>
    %9 = arith.truncf %8 : vector<64x256xf32> to vector<64x256xbf16>
    %c0_6 = arith.constant 0 : index
    %c0_7 = arith.constant 0 : index
    %10 = vector.load %arg6[%c0_6, %c0_7] : memref<256x256xbf16, #tpu.memory_space<vmem>>, vector<256x256xbf16>
    %cst_8 = arith.constant dense<0.000000e+00> : vector<64x256xf32>
    %11 = tpu.matmul %9, %10, %cst_8 {dimension_numbers = #tpu.dot_dimension_numbers<[1], [0], [0], [1], [0, 0, 1, 1], [], []>} : vector<64x256xbf16>, vector<256x256xbf16>, vector<64x256xf32> -> vector<64x256xf32>
    %c0_9 = arith.constant 0 : index
    %c0_10 = arith.constant 0 : index
    %12 = vector.load %arg7[%c0_9, %c0_10] : memref<1x256xf32, #tpu.memory_space<vmem>>, vector<1x256xf32>
    %13 = vector.broadcast %12 : vector<1x256xf32> to vector<64x256xf32>
    %14 = arith.addf %11, %13 : vector<64x256xf32>
    %cst_11 = arith.constant 0.000000e+00 : f32
    %15 = vector.broadcast %cst_11 : f32 to vector<64x256xf32>
    %16 = arith.maximumf %14, %15 : vector<64x256xf32>
    %17 = arith.truncf %16 : vector<64x256xf32> to vector<64x256xbf16>
    %c0_12 = arith.constant 0 : index
    %c0_13 = arith.constant 0 : index
    %18 = vector.load %arg8[%c0_12, %c0_13] : memref<256x256xbf16, #tpu.memory_space<vmem>>, vector<256x256xbf16>
    %cst_14 = arith.constant dense<0.000000e+00> : vector<64x256xf32>
    %19 = tpu.matmul %17, %18, %cst_14 {dimension_numbers = #tpu.dot_dimension_numbers<[1], [0], [0], [1], [0, 0, 1, 1], [], []>} : vector<64x256xbf16>, vector<256x256xbf16>, vector<64x256xf32> -> vector<64x256xf32>
    %c0_15 = arith.constant 0 : index
    %c0_16 = arith.constant 0 : index
    %20 = vector.load %arg9[%c0_15, %c0_16] : memref<1x256xf32, #tpu.memory_space<vmem>>, vector<1x256xf32>
    %21 = vector.broadcast %20 : vector<1x256xf32> to vector<64x256xf32>
    %22 = arith.addf %19, %21 : vector<64x256xf32>
    %23 = tpu.iota {dimensions = array<i32: 0>} : vector<8x64xi32>
    %24 = tpu.iota {dimensions = array<i32: 1>} : vector<8x64xi32>
    %c8_i32 = arith.constant 8 : i32
    %25 = vector.broadcast %c8_i32 : i32 to vector<8x64xi32>
    %26 = arith.muli %23, %25 : vector<8x64xi32>
    %27 = arith.subi %24, %26 : vector<8x64xi32>
    %c0_i32 = arith.constant 0 : i32
    %28 = vector.broadcast %c0_i32 : i32 to vector<8x64xi32>
    %29 = arith.cmpi sge, %27, %28 : vector<8x64xi32>
    %c8_i32_17 = arith.constant 8 : i32
    %30 = vector.broadcast %c8_i32_17 : i32 to vector<8x64xi32>
    %31 = arith.cmpi slt, %27, %30 : vector<8x64xi32>
    %32 = arith.andi %29, %31 : vector<8x64xi1>
    %c0_18 = arith.constant 0 : index
    %c0_19 = arith.constant 0 : index
    %33 = vector.load %arg3[%c0_18, %c0_19] : memref<8x1xi32, #tpu.memory_space<vmem>>, vector<8x1xi32>
    %34 = vector.broadcast %33 : vector<8x1xi32> to vector<8x64xi32>
    %35 = arith.cmpi slt, %27, %34 : vector<8x64xi32>
    %36 = arith.andi %32, %35 : vector<8x64xi1>
    %37 = arith.extui %36 : vector<8x64xi1> to vector<8x64xi32>
    %38 = arith.sitofp %37 : vector<8x64xi32> to vector<8x64xf32>
    %cst_20 = arith.constant dense<0.000000e+00> : vector<8x256xf32>
    %39 = tpu.matmul %38, %22, %cst_20 {dimension_numbers = #tpu.dot_dimension_numbers<[1], [0], [0], [1], [0, 0, 1, 1], [], []>} : vector<8x64xf32>, vector<64x256xf32>, vector<8x256xf32> -> vector<8x256xf32>
    %c0_21 = arith.constant 0 : index
    %c0_22 = arith.constant 0 : index
    %40 = vector.load %arg1[%c0_21, %c0_22] : memref<8x16xf32, #tpu.memory_space<vmem>>, vector<8x16xf32>
    %41 = arith.truncf %40 : vector<8x16xf32> to vector<8x16xbf16>
    %c0_23 = arith.constant 0 : index
    %c0_24 = arith.constant 0 : index
    %42 = vector.load %arg10[%c0_23, %c0_24] : memref<16x256xbf16, #tpu.memory_space<vmem>>, vector<16x256xbf16>
    %cst_25 = arith.constant dense<0.000000e+00> : vector<8x256xf32>
    %43 = tpu.matmul %41, %42, %cst_25 {dimension_numbers = #tpu.dot_dimension_numbers<[1], [0], [0], [1], [0, 0, 1, 1], [], []>} : vector<8x16xbf16>, vector<16x256xbf16>, vector<8x256xf32> -> vector<8x256xf32>
    %44 = arith.addf %39, %43 : vector<8x256xf32>
    %c0_26 = arith.constant 0 : index
    %c0_27 = arith.constant 0 : index
    %45 = vector.load %arg11[%c0_26, %c0_27] : memref<1x256xf32, #tpu.memory_space<vmem>>, vector<1x256xf32>
    %46 = vector.broadcast %45 : vector<1x256xf32> to vector<8x256xf32>
    %47 = arith.addf %44, %46 : vector<8x256xf32>
    %cst_28 = arith.constant 0.000000e+00 : f32
    %48 = vector.broadcast %cst_28 : f32 to vector<8x256xf32>
    %49 = arith.maximumf %47, %48 : vector<8x256xf32>
    %50 = arith.truncf %49 : vector<8x256xf32> to vector<8x256xbf16>
    %c0_29 = arith.constant 0 : index
    %c0_30 = arith.constant 0 : index
    %51 = vector.load %arg12[%c0_29, %c0_30] : memref<256x256xbf16, #tpu.memory_space<vmem>>, vector<256x256xbf16>
    %cst_31 = arith.constant dense<0.000000e+00> : vector<8x256xf32>
    %52 = tpu.matmul %50, %51, %cst_31 {dimension_numbers = #tpu.dot_dimension_numbers<[1], [0], [0], [1], [0, 0, 1, 1], [], []>} : vector<8x256xbf16>, vector<256x256xbf16>, vector<8x256xf32> -> vector<8x256xf32>
    %c0_32 = arith.constant 0 : index
    %c0_33 = arith.constant 0 : index
    %53 = vector.load %arg13[%c0_32, %c0_33] : memref<1x256xf32, #tpu.memory_space<vmem>>, vector<1x256xf32>
    %54 = vector.broadcast %53 : vector<1x256xf32> to vector<8x256xf32>
    %55 = arith.addf %52, %54 : vector<8x256xf32>
    %cst_34 = arith.constant 0.000000e+00 : f32
    %56 = vector.broadcast %cst_34 : f32 to vector<8x256xf32>
    %57 = arith.maximumf %55, %56 : vector<8x256xf32>
    %58 = arith.truncf %57 : vector<8x256xf32> to vector<8x256xbf16>
    %c0_35 = arith.constant 0 : index
    %c0_36 = arith.constant 0 : index
    %59 = vector.load %arg14[%c0_35, %c0_36] : memref<256x128xbf16, #tpu.memory_space<vmem>>, vector<256x128xbf16>
    %cst_37 = arith.constant dense<0.000000e+00> : vector<8x128xf32>
    %60 = tpu.matmul %58, %59, %cst_37 {dimension_numbers = #tpu.dot_dimension_numbers<[1], [0], [0], [1], [0, 0, 1, 1], [], []>} : vector<8x256xbf16>, vector<256x128xbf16>, vector<8x128xf32> -> vector<8x128xf32>
    %c0_38 = arith.constant 0 : index
    %c0_39 = arith.constant 0 : index
    %61 = vector.load %arg15[%c0_38, %c0_39] : memref<1x128xf32, #tpu.memory_space<vmem>>, vector<1x128xf32>
    %62 = vector.broadcast %61 : vector<1x128xf32> to vector<8x128xf32>
    %63 = arith.addf %60, %62 : vector<8x128xf32>
    %c0_40 = arith.constant 0 : index
    %c0_41 = arith.constant 0 : index
    %64 = vector.load %arg16[%c0_40, %c0_41] : memref<8x128xf32, #tpu.memory_space<vmem>>, vector<8x128xf32>
    tpu.vector_store %arg16[%c0_40, %c0_41], %63 {strides = array<i32>} : memref<8x128xf32, #tpu.memory_space<vmem>>, vector<8x128xf32>,
    return
  }
  func.func @transform_0(%arg0: i32) -> (i32, i32) {
    %c0_i32 = arith.constant 0 : i32
    %c0_i32_0 = arith.constant 0 : i32
    return %arg0, %c0_i32 : i32, i32
  }
  func.func @transform_1(%arg0: i32) -> (i32, i32) {
    %c0_i32 = arith.constant 0 : i32
    %c0_i32_0 = arith.constant 0 : i32
    return %arg0, %c0_i32 : i32, i32
  }
  func.func @transform_2(%arg0: i32) -> (i32, i32) {
    %c0_i32 = arith.constant 0 : i32
    %c0_i32_0 = arith.constant 0 : i32
    return %arg0, %c0_i32 : i32, i32
  }
  func.func @transform_3(%arg0: i32) -> (i32, i32) {
    %c0_i32 = arith.constant 0 : i32
    %c0_i32_0 = arith.constant 0 : i32
    %c0_i32_1 = arith.constant 0 : i32
    return %c0_i32, %c0_i32_0 : i32, i32
  }
  func.func @transform_4(%arg0: i32) -> (i32, i32) {
    %c0_i32 = arith.constant 0 : i32
    %c0_i32_0 = arith.constant 0 : i32
    %c0_i32_1 = arith.constant 0 : i32
    return %c0_i32, %c0_i32_0 : i32, i32
  }
  func.func @transform_5(%arg0: i32) -> (i32, i32) {
    %c0_i32 = arith.constant 0 : i32
    %c0_i32_0 = arith.constant 0 : i32
    %c0_i32_1 = arith.constant 0 : i32
    return %c0_i32, %c0_i32_0 : i32, i32
  }
  func.func @transform_6(%arg0: i32) -> (i32, i32) {
    %c0_i32 = arith.constant 0 : i32
    %c0_i32_0 = arith.constant 0 : i32
    %c0_i32_1 = arith.constant 0 : i32
    return %c0_i32, %c0_i32_0 : i32, i32
  }
  func.func @transform_7(%arg0: i32) -> (i32, i32) {
    %c0_i32 = arith.constant 0 : i32
    %c0_i32_0 = arith.constant 0 : i32
    %c0_i32_1 = arith.constant 0 : i32
    return %c0_i32, %c0_i32_0 : i32, i32
  }
  func.func @transform_8(%arg0: i32) -> (i32, i32) {
    %c0_i32 = arith.constant 0 : i32
    %c0_i32_0 = arith.constant 0 : i32
    %c0_i32_1 = arith.constant 0 : i32
    return %c0_i32, %c0_i32_0 : i32, i32
  }
  func.func @transform_9(%arg0: i32) -> (i32, i32) {
    %c0_i32 = arith.constant 0 : i32
    %c0_i32_0 = arith.constant 0 : i32
    %c0_i32_1 = arith.constant 0 : i32
    return %c0_i32, %c0_i32_0 : i32, i32
  }
  func.func @transform_10(%arg0: i32) -> (i32, i32) {
    %c0_i32 = arith.constant 0 : i32
    %c0_i32_0 = arith.constant 0 : i32
    %c0_i32_1 = arith.constant 0 : i32
    return %c0_i32, %c0_i32_0 : i32, i32
  }
  func.func @transform_11(%arg0: i32) -> (i32, i32) {
    %c0_i32 = arith.constant 0 : i32
    %c0_i32_0 = arith.constant 0 : i32
    %c0_i32_1 = arith.constant 0 : i32
    return %c0_i32, %c0_i32_0 : i32, i32
  }
  func.func @transform_12(%arg0: i32) -> (i32, i32) {
    %c0_i32 = arith.constant 0 : i32
    %c0_i32_0 = arith.constant 0 : i32
    %c0_i32_1 = arith.constant 0 : i32
    return %c0_i32, %c0_i32_0 : i32, i32
  }
  func.func @transform_13(%arg0: i32) -> (i32, i32) {
    %c0_i32 = arith.constant 0 : i32
    %c0_i32_0 = arith.constant 0 : i32
    %c0_i32_1 = arith.constant 0 : i32
    return %c0_i32, %c0_i32_0 : i32, i32
  }
  func.func @transform_14(%arg0: i32) -> (i32, i32) {
    %c0_i32 = arith.constant 0 : i32
    %c0_i32_0 = arith.constant 0 : i32
    %c0_i32_1 = arith.constant 0 : i32
    return %c0_i32, %c0_i32_0 : i32, i32
  }
  func.func @transform_15(%arg0: i32) -> (i32, i32) {
    %c0_i32 = arith.constant 0 : i32
    %c0_i32_0 = arith.constant 0 : i32
    return %arg0, %c0_i32 : i32, i32
  }
}

</mosaic_0001>

<bundles_post_ra>
// kernel: tpu_custom_call.1
= control target key start
LH: loop header
LB: loop body
LE: loop exit
PB: predicated region body
PF: predicated region fallthrough
CT: control target
= control target key end

     0   :  { %20 = vsyncpa [#allocation3], 0  ;;  %s2073_s0 = inlined_call_operand.vmem [shape: f32[8,16], index: 0, kind: input, shape index: {}]   ;;  %s2074_s1 = inlined_call_operand.vmem [shape: f32[64,16], index: 1, kind: input, shape index: {}]   ;;  %s2075_s2 = inlined_call_operand.vmem [shape: s32[8,1], index: 2, kind: input, shape index: {}]   ;;  %s2076_s3 = inlined_call_operand.vmem [shape: bf16[16,256], index: 3, kind: input, shape index: {}]   ;;  %s2077_s4 = inlined_call_operand.vmem [shape: f32[1,256], index: 4, kind: input, shape index: {}]   ;;  %s2078_s5 = inlined_call_operand.hbm [shape: bf16[256,256], index: 5, kind: input, shape index: {}]   ;;  %s2079_s6 = inlined_call_operand.vmem [shape: f32[1,256], index: 6, kind: input, shape index: {}]   ;;  %s2080_s7 = inlined_call_operand.hbm [shape: bf16[256,256], index: 7, kind: input, shape index: {}]   ;;  %s2081_s8 = inlined_call_operand.vmem [shape: f32[1,256], index: 8, kind: input, shape index: {}]   ;;  %s2082_s9 = inlined_call_operand.vmem [shape: bf16[16,256], index: 9, kind: input, shape index: {}]   ;;  %s2083_s10 = inlined_call_operand.vmem [shape: f32[1,256], index: 10, kind: input, shape index: {}]   ;;  %s2084_s11 = inlined_call_operand.hbm [shape: bf16[256,256], index: 11, kind: input, shape index: {}]   ;;  %s2085_s12 = inlined_call_operand.vmem [shape: f32[1,256], index: 12, kind: input, shape index: {}]   ;;  %s2086_s13 = inlined_call_operand.hbm [shape: bf16[256,128], index: 13, kind: input, shape index: {}]   ;;  %s2087_s14 = inlined_call_operand.vmem [shape: f32[1,128], index: 14, kind: input, shape index: {}]   ;;  %s2088_s15 = inlined_call_operand.hbm [shape: f32[8,128], index: 15, kind: output, shape index: {}]  }
   0x1   :  { %21 = vsyncpa [#allocation6], 0 }
   0x2   :  { %22 = vsyncpa [#allocation9], 0 }
   0x3   :  { %23 = vsyncpa [#allocation4], 0  ;;  %s1873_s18 = smov [#allocation5]   ;;  %s1874_s20 = smov [#allocation2]  }
   0x4   :  { %s53_s19 = sshll.u32 %s1873_s18, 4  ;;  %s39_s21 = sshll.u32 %s1874_s20, 4  ;;  %s54_s19 = int_to_ptr.vmem [resolvable:$true] %s53_s19  ;;  %s40_s21 = int_to_ptr.vmem [resolvable:$true] %s39_s21 }
   0x5   :  { %s1773_s22 = scalar_lea.vmem %s54_s19, 4096  ;;  %p1778_p1 = scmp.lt.s32.totalorder %s54_s19, %s54_s19 }
   0x6   :  { %p1774_p0 = scmp.ne.s32.totalorder %s54_s19, %s1773_s22  ;;  %p1779_p2 = scmp.lt.s32.totalorder %s1773_s22, %s1773_s22 }
   0x8   :  { %p1780_p3 = por %p1779_p2, %p1778_p1 }
   0xa   :  { %p1781_p4 = pnand %p1780_p3, %p1774_p0 }
   0xc   :  { %1784 = shalt.err (!%p1781_p4)
}
   0xd   :  { %s1875_s23 = smov 128   ;;  %s1876_s24 = smov 8  }
   0xe   :  { %59 = dma.hbm_to_vmem [thread:$0]  %s2080_s7, 4096, %s54_s19, [#allocation6], %s1875_s23, %s1875_s23, %s1876_s24  }
   0xf   :  { %s1793_s27 = scalar_lea.vmem %s40_s21, 4096  ;;  %p1798_p6 = scmp.lt.s32.totalorder %s40_s21, %s40_s21 }
  0x10   :  { %p1794_p5 = scmp.ne.s32.totalorder %s40_s21, %s1793_s27  ;;  %p1799_p7 = scmp.lt.s32.totalorder %s1793_s27, %s1793_s27 }
  0x12   :  { %p1800_p8 = por %p1799_p7, %p1798_p6 }
  0x14   :  { %p1801_p9 = pnand %p1800_p8, %p1794_p5 }
  0x16   :  { %1804 = shalt.err (!%p1801_p9)
}
  0x17   :  { %45 = dma.hbm_to_vmem [thread:$0]  %s2078_s5, 4096, %s40_s21, [#allocation3], %s1875_s23, %s1875_s23, %s1876_s24  }
  0x18   :  { %s1877_s30 = smov [#allocation7]   ;;  %s1878_s17 = smov [#allocation8]  }
  0x19   :  { %s71_s16 = sshll.u32 %s1877_s30, 4  ;;  %s85_s18 = sshll.u32 %s1878_s17, 4  ;;  %s72_s16 = int_to_ptr.vmem [resolvable:$true] %s71_s16  ;;  %s86_s18 = int_to_ptr.vmem [resolvable:$true] %s85_s18 }
  0x1a   :  { %s1813_s20 = scalar_lea.vmem %s72_s16, 4096  ;;  %p1818_p11 = scmp.lt.s32.totalorder %s72_s16, %s72_s16 }
  0x1b   :  { %p1814_p10 = scmp.ne.s32.totalorder %s72_s16, %s1813_s20  ;;  %p1819_p12 = scmp.lt.s32.totalorder %s1813_s20, %s1813_s20 }
  0x1d   :  { %p1820_p13 = por %p1819_p12, %p1818_p11 }
  0x1f   :  { %p1821_p0 = pnand %p1820_p13, %p1814_p10 }
  0x21   :  { %1824 = shalt.err (!%p1821_p0)
}
  0x22   :  { %77 = dma.hbm_to_vmem [thread:$0]  %s2084_s11, 4096, %s72_s16, [#allocation6], %s1875_s23, %s1875_s23, %s1876_s24  }
  0x23   :  { %s1833_s22 = scalar_lea.vmem %s86_s18, 2048  ;;  %p1838_p2 = scmp.lt.s32.totalorder %s86_s18, %s86_s18 }
  0x24   :  { %p1834_p1 = scmp.ne.s32.totalorder %s86_s18, %s1833_s22  ;;  %p1839_p3 = scmp.lt.s32.totalorder %s1833_s22, %s1833_s22 }
  0x26   :  { %p1840_p4 = por %p1839_p3, %p1838_p2 }
  0x28   :  { %p1841_p5 = pnand %p1840_p4, %p1834_p1 }
  0x2a   :  { %1844 = shalt.err (!%p1841_p5)
}
  0x2b   :  { %s1879_s5 = smov 64   ;;  %s1880_s21 = smov 4  }
  0x2c   :  { %91 = dma.hbm_to_vmem [thread:$0]  %s2086_s13, 2048, %s86_s18, [#allocation9], %s1879_s5, %s1879_s5, %s1880_s21  }
  0x2d   :  { %1865 = dma.done.wait [#allocation3], 4096  }
  0x2e   :  { %1866 = vsyncadd [#allocation3], 4294963200 }
  0x2f   :  { %1867 = dma.done.wait [#allocation6], 8192  }
  0x30   :  { %1868 = vsyncadd [#allocation6], 4294959104 }
  0x31   :  { %1869 = dma.done.wait [#allocation9], 2048  }
  0x32   :  { %1870 = vsyncadd [#allocation9], 4294965248  ;;  %v1881_v0 = vmov 0   ;;  %v1599_v1 = vld [vmem:[%s2076_s3 + $0x4] ss:$8 sps:$4 sm:$0xff]   ;;  %vm143_vm0 = vcmask 130048  }
  0x33   :  { %188 = vmatprep.mubr.bf16.mxu1 %v1881_v0  ;;  %1598 = vset.pattern.permute.xlu0 %v1881_v0  ;;  %v1601_v2 = vld [vmem:[%s2076_s3] ss:$8 sps:$4 sm:$0xff]   ;;  %v1602_v6 = vld [vmem:[#allocation2 + $0x70] ss:$8 sps:$4 sm:$0xff]   ;;  %v1604_v7 = vld [vmem:[#allocation2 + $0x74] ss:$8 sps:$4 sm:$0xff]  }
  0x34   :  { %v107_v3 = vld [vmem:[%s2074_s1] sm:$0xff]  ;;  %v108_v4 = vld [vmem:[%s2074_s1 + $0x8] sm:$0xff]  ;;  %170 = vmatprep.subr.bf16.mxu1 %v1599_v1  ;;  %v109_v9 = vld [vmem:[%s2074_s1 + $0x10] sm:$0xff]  ;;  %vm906_vm6 = vcmask 523264  }
  0x35   :  { %v115_v5 = vpack.c.bf16 %v108_v4, %v107_v3  ;;  %171 = vmatpush1.bf16.msra.mxu1 %v1601_v2  ;;  %v1607_v8 = vld [vmem:[#allocation2 + $0x64] ss:$8 sps:$4 sm:$0xff]   ;;  %v110_v10 = vld [vmem:[%s2074_s1 + $0x18] sm:$0xff]  ;;  %v1605_v11 = vld [vmem:[#allocation2 + $0x60] ss:$8 sps:$4 sm:$0xff]  }
  0x36   :  { %457 = vmatprep.subr.bf16.mxu1 %v1604_v7  ;;  %v1610_v12 = vld [vmem:[#allocation2 + $0x54] ss:$8 sps:$4 sm:$0xff]   ;;  %v116_v13 = vpack.c.bf16 %v110_v10, %v109_v9  ;;  %v1608_v14 = vld [vmem:[#allocation2 + $0x50] ss:$8 sps:$4 sm:$0xff]   ;;  %v1613_v15 = vld [vmem:[#allocation2 + $0x44] ss:$8 sps:$4 sm:$0xff]   ;;  %v123_v10 = vlaneseq }
  0x37   :  { %v111_v16 = vld [vmem:[%s2074_s1 + $0x20] sm:$0xff]  ;;  %v112_v17 = vld [vmem:[%s2074_s1 + $0x28] sm:$0xff]  ;;  %v1616_v19 = vld [vmem:[#allocation2 + $0x34] ss:$8 sps:$4 sm:$0xff]  }
  0x38   :  { %1443 = vmatmul.mubr.msk.bf16.vlgmr.msra.gmra.mxu1 %vm143_vm0, %v115_v5  ;;  %v1611_v18 = vld [vmem:[#allocation2 + $0x40] ss:$8 sps:$4 sm:$0xff]   ;;  %v117_v20 = vpack.c.bf16 %v112_v17, %v111_v16  ;;  %v1614_v21 = vld [vmem:[#allocation2 + $0x30] ss:$8 sps:$4 sm:$0xff]   ;;  %v1619_v24 = vld [vmem:[#allocation2 + $0x24] ss:$8 sps:$4 sm:$0xff]  }
  0x39   :  { %198 = vmatprep.mubr.bf16.mxu1 %v1881_v0  ;;  %458 = vmatpush1.bf16.msra.mxu1 %v1602_v6  ;;  %v113_v22 = vld [vmem:[%s2074_s1 + $0x30] sm:$0xff]  ;;  %v114_v23 = vld [vmem:[%s2074_s1 + $0x38] sm:$0xff]  ;;  %v1617_v25 = vld [vmem:[#allocation2 + $0x20] ss:$8 sps:$4 sm:$0xff]  }
  0x3a   :  { %459 = vmatprep.subr.bf16.mxu1 %v1607_v8  ;;  %v1622_v26 = vld [vmem:[#allocation2 + $0x14] ss:$8 sps:$4 sm:$0xff]   ;;  %v118_v27 = vpack.c.bf16 %v114_v23, %v113_v22  ;;  %v1620_v28 = vld [vmem:[#allocation2 + $0x10] ss:$8 sps:$4 sm:$0xff]   ;;  %v1625_v29 = vld [vmem:[#allocation2 + $0x4] ss:$8 sps:$4 sm:$0xff]  }
  0x3b   :  { %v1623_v30 = vld [vmem:[#allocation2] ss:$8 sps:$4 sm:$0xff]   ;;  %v1628_v31 = vld [vmem:[#allocation2 + $0xf4] ss:$8 sps:$4 sm:$0xff]   ;;  %v1626_v32 = vld [vmem:[#allocation2 + $0xf0] ss:$8 sps:$4 sm:$0xff]  }
  0x3c   :  { %v1631_v33 = vld [vmem:[#allocation2 + $0xe4] ss:$8 sps:$4 sm:$0xff]   ;;  %v1629_v34 = vld [vmem:[#allocation2 + $0xe0] ss:$8 sps:$4 sm:$0xff]   ;;  %v1634_v35 = vld [vmem:[#allocation2 + $0xd4] ss:$8 sps:$4 sm:$0xff]  }
  0x3d   :  { %460 = vmatpush1.bf16.msra.mxu1 %v1605_v11  ;;  %v1632_v36 = vld [vmem:[#allocation2 + $0xd0] ss:$8 sps:$4 sm:$0xff]   ;;  %v1637_v37 = vld [vmem:[#allocation2 + $0xc4] ss:$8 sps:$4 sm:$0xff]   ;;  %v1635_v38 = vld [vmem:[#allocation2 + $0xc0] ss:$8 sps:$4 sm:$0xff]  }
  0x3e   :  { %461 = vmatprep.subr.bf16.mxu1 %v1610_v12  ;;  %v1640_v39 = vld [vmem:[#allocation2 + $0xb4] ss:$8 sps:$4 sm:$0xff]   ;;  %v1638_v40 = vld [vmem:[#allocation2 + $0xb0] ss:$8 sps:$4 sm:$0xff]   ;;  %v1643_v41 = vld [vmem:[#allocation2 + $0xa4] ss:$8 sps:$4 sm:$0xff]  }
  0x3f   :  { %v1641_v42 = vld [vmem:[#allocation2 + $0xa0] ss:$8 sps:$4 sm:$0xff]   ;;  %v1646_v43 = vld [vmem:[#allocation2 + $0x94] ss:$8 sps:$4 sm:$0xff]   ;;  %v1644_v44 = vld [vmem:[#allocation2 + $0x90] ss:$8 sps:$4 sm:$0xff]  }
  0x40   :  { %1444 = vmatmul.mubr.msk.bf16.gmra.mxu1 %vm143_vm0, %v116_v13  ;;  %v1649_v45 = vld [vmem:[#allocation2 + $0x84] ss:$8 sps:$4 sm:$0xff]   ;;  %v1647_v46 = vld [vmem:[#allocation2 + $0x80] ss:$8 sps:$4 sm:$0xff]   ;;  %v1650_v47 = vld [vmem:[#allocation5 + $0x74] ss:$8 sps:$4 sm:$0xff]  }
  0x41   :  { %208 = vmatprep.mubr.bf16.mxu1 %v1881_v0  ;;  %462 = vmatpush1.bf16.msra.mxu1 %v1608_v14  ;;  %v1652_v48 = vld [vmem:[#allocation5 + $0x70] ss:$8 sps:$4 sm:$0xff]   ;;  %v1653_v49 = vld [vmem:[#allocation5 + $0x64] ss:$8 sps:$4 sm:$0xff]   ;;  %v1655_v50 = vld [vmem:[#allocation5 + $0x60] ss:$8 sps:$4 sm:$0xff]  }
  0x42   :  { %463 = vmatprep.subr.bf16.mxu1 %v1613_v15  ;;  %758 = vmatprep.subr.bf16.mxu0 %v1650_v47  ;;  %v1656_v51 = vld [vmem:[#allocation5 + $0x54] ss:$8 sps:$4 sm:$0xff]   ;;  %v1658_v52 = vld [vmem:[#allocation5 + $0x50] ss:$8 sps:$4 sm:$0xff]   ;;  %v1659_v53 = vld [vmem:[#allocation5 + $0x44] ss:$8 sps:$4 sm:$0xff]  }
  0x43   :  { %759 = vmatpush1.bf16.msra.mxu0 %v1652_v48  ;;  %v1661_v54 = vld [vmem:[#allocation5 + $0x40] ss:$8 sps:$4 sm:$0xff]   ;;  %v1662_v55 = vld [vmem:[#allocation5 + $0x34] ss:$8 sps:$4 sm:$0xff]   ;;  %v1664_v56 = vld [vmem:[#allocation5 + $0x30] ss:$8 sps:$4 sm:$0xff]  }
  0x44   :  { %760 = vmatprep.subr.bf16.mxu0 %v1653_v49  ;;  %v1665_v57 = vld [vmem:[#allocation5 + $0x24] ss:$8 sps:$4 sm:$0xff]   ;;  %v1667_v58 = vld [vmem:[#allocation5 + $0x20] ss:$8 sps:$4 sm:$0xff]   ;;  %v1668_v59 = vld [vmem:[#allocation5 + $0x14] ss:$8 sps:$4 sm:$0xff]  }
  0x45   :  { %464 = vmatpush1.bf16.msra.mxu1 %v1611_v18  ;;  %v1670_v60 = vld [vmem:[#allocation5 + $0x10] ss:$8 sps:$4 sm:$0xff]   ;;  %v1671_v61 = vld [vmem:[#allocation5 + $0x4] ss:$8 sps:$4 sm:$0xff]   ;;  %v1673_v62 = vld [vmem:[#allocation5] ss:$8 sps:$4 sm:$0xff]  }
  0x46   :  { %465 = vmatprep.subr.bf16.mxu1 %v1616_v19  ;;  %v1674_v63 = vld [vmem:[#allocation5 + $0xf4] ss:$8 sps:$4 sm:$0xff]   ;;  %v1676_v1 = vld [vmem:[#allocation5 + $0xf0] ss:$8 sps:$4 sm:$0xff]   ;;  %v1677_v2 = vld [vmem:[#allocation5 + $0xe4] ss:$8 sps:$4 sm:$0xff]  }
  0x47   :  { %761 = vmatpush1.bf16.msra.mxu0 %v1655_v50  ;;  %v1679_v3 = vld [vmem:[#allocation5 + $0xe0] ss:$8 sps:$4 sm:$0xff]   ;;  %v1680_v4 = vld [vmem:[#allocation5 + $0xd4] ss:$8 sps:$4 sm:$0xff]   ;;  %v1682_v5 = vld [vmem:[#allocation5 + $0xd0] ss:$8 sps:$4 sm:$0xff]  }
  0x48   :  { %1445 = vmatmul.mubr.msk.bf16.gmra.mxu1 %vm143_vm0, %v117_v20  ;;  %762 = vmatprep.subr.bf16.mxu0 %v1656_v51  ;;  %v1683_v6 = vld [vmem:[#allocation5 + $0xc4] ss:$8 sps:$4 sm:$0xff]   ;;  %v1685_v7 = vld [vmem:[#allocation5 + $0xc0] ss:$8 sps:$4 sm:$0xff]   ;;  %v1686_v8 = vld [vmem:[#allocation5 + $0xb4] ss:$8 sps:$4 sm:$0xff]  }
  0x49   :  { %218 = vmatprep.mubr.bf16.mxu1 %v1881_v0  ;;  %466 = vmatpush1.bf16.msra.mxu1 %v1614_v21  ;;  %v1688_v9 = vld [vmem:[#allocation5 + $0xb0] ss:$8 sps:$4 sm:$0xff]   ;;  %v2016_v11 = vshrl.u32 %v123_v10, 7  ;;  %v121_v14 = vld [vmem:[%s2077_s4] sm:$0x3] }
  0x4a   :  { %467 = vmatprep.subr.bf16.mxu1 %v1619_v24 }
  0x4b   :  { %763 = vmatpush1.bf16.msra.mxu0 %v1658_v52  ;;  %v2019_v12 = vsub.s32 1, %v2016_v11  ;;  %v2022_v13 = vsub.s32 0, %v2016_v11 }
  0x4c   :  { %764 = vmatprep.subr.bf16.mxu0 %v1659_v53 }
  0x4d   :  { %468 = vmatpush1.bf16.msra.mxu1 %v1617_v25  ;;  %v130_v16 = vrot.slane %v121_v14, %v2019_v12  ;;  %v126_v17 = vrot.slane %v121_v14, %v2022_v13  ;;  %v1689_v14 = vld [vmem:[#allocation5 + $0xa4] ss:$8 sps:$4 sm:$0xff]  }
  0x4e   :  { %469 = vmatprep.subr.bf16.mxu1 %v1622_v26 }
  0x4f   :  { %765 = vmatpush1.bf16.msra.mxu0 %v1661_v54 }
  0x50   :  { %1446 = vmatmul.mubr.msk.bf16.gmra.mxu1 %vm143_vm0, %v118_v27  ;;  %766 = vmatprep.subr.bf16.mxu0 %v1662_v55 }
  0x51   :  { %470 = vmatpush1.bf16.msra.mxu1 %v1620_v28 }
  0x52   :  { %471 = vmatprep.subr.bf16.mxu1 %v1625_v29 }
  0x53   :  { %767 = vmatpush1.bf16.msra.mxu0 %v1664_v56 }
  0x54   :  { %768 = vmatprep.subr.bf16.mxu0 %v1665_v57 }
  0x55   :  { %472 = vmatpush1.bf16.msra.mxu1 %v1623_v30 }
  0x56   :  { %473 = vmatprep.subr.bf16.mxu1 %v1628_v31 }
  0x57   :  { %769 = vmatpush1.bf16.msra.mxu0 %v1667_v58 }
  0x58   :  { %770 = vmatprep.subr.bf16.mxu0 %v1668_v59 }
  0x59   :  { %474 = vmatpush2.bf16.msra.mxu1 %v1626_v32 }
  0x5a   :  { %475 = vmatprep.subr.bf16.mxu1 %v1631_v33 }
  0x5b   :  { %771 = vmatpush1.bf16.msra.mxu0 %v1670_v60 }
  0x5c   :  { %772 = vmatprep.subr.bf16.mxu0 %v1671_v61 }
  0x5d   :  { %476 = vmatpush2.bf16.msra.mxu1 %v1629_v34 }
  0x5e   :  { %477 = vmatprep.subr.bf16.mxu1 %v1634_v35 }
  0x5f   :  { %773 = vmatpush1.bf16.msra.mxu0 %v1673_v62 }
  0x60   :  { %774 = vmatprep.subr.bf16.mxu0 %v1674_v63 }
  0x61   :  { %478 = vmatpush2.bf16.msra.mxu1 %v1632_v36 }
  0x62   :  { %479 = vmatprep.subr.bf16.mxu1 %v1637_v37 }
  0x63   :  { %775 = vmatpush2.bf16.msra.mxu0 %v1676_v1 }
  0x64   :  { %776 = vmatprep.subr.bf16.mxu0 %v1677_v2 }
  0x65   :  { %480 = vmatpush2.bf16.msra.mxu1 %v1635_v38 }
  0x66   :  { %481 = vmatprep.subr.bf16.mxu1 %v1640_v39 }
  0x67   :  { %777 = vmatpush2.bf16.msra.mxu0 %v1679_v3 }
  0x68   :  { %778 = vmatprep.subr.bf16.mxu0 %v1680_v4 }
  0x69   :  { %482 = vmatpush2.bf16.msra.mxu1 %v1638_v40 }
  0x6a   :  { %483 = vmatprep.subr.bf16.mxu1 %v1643_v41 }
  0x6b   :  { %779 = vmatpush2.bf16.msra.mxu0 %v1682_v5 }
  0x6c   :  { %780 = vmatprep.subr.bf16.mxu0 %v1683_v6 }
  0x6d   :  { %484 = vmatpush2.bf16.msra.mxu1 %v1641_v42 }
  0x6e   :  { %485 = vmatprep.subr.bf16.mxu1 %v1646_v43 }
  0x6f   :  { %781 = vmatpush2.bf16.msra.mxu0 %v1685_v7 }
  0x70   :  { %782 = vmatprep.subr.bf16.mxu0 %v1686_v8 }
  0x71   :  { %486 = vmatpush2.bf16.msra.mxu1 %v1644_v44 }
  0x72   :  { %487 = vmatprep.subr.bf16.mxu1 %v1649_v45 }
  0x73   :  { %783 = vmatpush2.bf16.msra.mxu0 %v1688_v9 }
  0x74   :  { %784 = vmatprep.subr.bf16.mxu0 %v1689_v14 }
  0x75   :  { %488 = vmatpush2.bf16.msra.mxu1 %v1647_v46 }
  0xf8   :  { %v190_v15 = vpop.f32.mrf.mxu1 }
  0xf9   :  { %v191_v22 = vadd.f32 %v190_v15, %v126_v17  ;;  %v1691_v15 = vld [vmem:[#allocation5 + $0xa0] ss:$8 sps:$4 sm:$0xff]  }
  0xfa   :  { %v192_v18 = vpop.f32.mrf.mxu1  ;;  %785 = vmatpush2.bf16.msra.mxu0 %v1691_v15 }
  0xfb   :  { %v193_v20 = vadd.f32 %v192_v18, %v130_v16  ;;  %v229_v29 = vmax.f32 %v191_v22, 0.0  ;;  %v1692_v18 = vld [vmem:[#allocation5 + $0x94] ss:$8 sps:$4 sm:$0xff]  }
  0xfc   :  { %v194_v19 = vpop.f32.mrf.mxu1  ;;  %786 = vmatprep.subr.bf16.mxu0 %v1692_v18 }
  0xfd   :  { %v195_v21 = vadd.f32 %v194_v19, %v126_v17  ;;  %v230_v27 = vmax.f32 %v193_v20, 0.0  ;;  %v1694_v19 = vld [vmem:[#allocation5 + $0x90] ss:$8 sps:$4 sm:$0xff]   ;;  %v1697_v20 = vld [vmem:[#allocation5 + $0x80] ss:$8 sps:$4 sm:$0xff]  }
  0xfe   :  { %v196_v23 = vpop.f32.mrf.mxu1  ;;  %787 = vmatpush2.bf16.msra.mxu0 %v1694_v19 }
  0xff   :  { %v197_v24 = vadd.f32 %v196_v23, %v130_v16  ;;  %v231_v25 = vmax.f32 %v195_v21, 0.0  ;;  %v285_v21 = vld [vmem:[%s2079_s6] sm:$0x3] }
 0x100   :  { %v200_v26 = vpop.f32.mrf.mxu1  ;;  %v294_v23 = vrot.slane %v285_v21, %v2019_v12 }
 0x101   :  { %v232_v28 = vmax.f32 %v197_v24, 0.0  ;;  %v245_v32 = vpack.c.bf16 %v231_v25, %v229_v29  ;;  %v201_v36 = vadd.f32 %v200_v26, %v126_v17  ;;  %v290_v24 = vrot.slane %v285_v21, %v2022_v13  ;;  %v1698_v21 = vld [vmem:[%s2082_s9] ss:$8 sps:$4 sm:$0xff]  }
 0x102   :  { %v202_v30 = vpop.f32.mrf.mxu1 }
 0x103   :  { %v246_v31 = vpack.c.bf16 %v232_v28, %v230_v27  ;;  %v203_v34 = vadd.f32 %v202_v30, %v130_v16  ;;  %v233_v43 = vmax.f32 %v201_v36, 0.0 }
 0x104   :  { %v204_v33 = vpop.f32.mrf.mxu1 }
 0x105   :  { %v205_v35 = vadd.f32 %v204_v33, %v126_v17  ;;  %489 = vmatprep.mubr.bf16.mxu1 %v246_v31  ;;  %v234_v41 = vmax.f32 %v203_v34, 0.0 }
 0x106   :  { %v206_v37 = vpop.f32.mrf.mxu1  ;;  %490 = vmatmul.mubr.bf16.vlgmr.msra.gmra.mxu1 %v245_v32 }
 0x107   :  { %v207_v38 = vadd.f32 %v206_v37, %v130_v16  ;;  %v235_v39 = vmax.f32 %v205_v35, 0.0 }
 0x108   :  { %v210_v40 = vpop.f32.mrf.mxu1 }
 0x109   :  { %v236_v42 = vmax.f32 %v207_v38, 0.0  ;;  %v247_v46 = vpack.c.bf16 %v235_v39, %v233_v43  ;;  %v211_v50 = vadd.f32 %v210_v40, %v126_v17 }
 0x10a   :  { %v212_v44 = vpop.f32.mrf.mxu1 }
 0x10b   :  { %v248_v45 = vpack.c.bf16 %v236_v42, %v234_v41  ;;  %v213_v48 = vadd.f32 %v212_v44, %v130_v16  ;;  %v237_v57 = vmax.f32 %v211_v50, 0.0 }
 0x10c   :  { %v214_v47 = vpop.f32.mrf.mxu1 }
 0x10d   :  { %v215_v49 = vadd.f32 %v214_v47, %v126_v17  ;;  %499 = vmatprep.mubr.bf16.mxu1 %v248_v45  ;;  %v238_v55 = vmax.f32 %v213_v48, 0.0 }
 0x10e   :  { %v216_v51 = vpop.f32.mrf.mxu1  ;;  %500 = vmatmul.mubr.bf16.gmra.mxu1 %v247_v46 }
 0x10f   :  { %v217_v52 = vadd.f32 %v216_v51, %v130_v16  ;;  %v239_v53 = vmax.f32 %v215_v49, 0.0 }
 0x110   :  { %v220_v54 = vpop.f32.mrf.mxu1 }
 0x111   :  { %v240_v56 = vmax.f32 %v217_v52, 0.0  ;;  %v249_v60 = vpack.c.bf16 %v239_v53, %v237_v57  ;;  %v221_v1 = vadd.f32 %v220_v54, %v126_v17 }
 0x112   :  { %v222_v58 = vpop.f32.mrf.mxu1 }
 0x113   :  { %v250_v59 = vpack.c.bf16 %v240_v56, %v238_v55  ;;  %v223_v62 = vadd.f32 %v222_v58, %v130_v16  ;;  %v241_v7 = vmax.f32 %v221_v1, 0.0 }
 0x114   :  { %v224_v61 = vpop.f32.mrf.mxu1 }
 0x115   :  { %v225_v63 = vadd.f32 %v224_v61, %v126_v17  ;;  %509 = vmatprep.mubr.bf16.mxu1 %v250_v59  ;;  %v242_v5 = vmax.f32 %v223_v62, 0.0  ;;  %v1695_v17 = vld [vmem:[#allocation5 + $0x84] ss:$8 sps:$4 sm:$0xff]  }
 0x116   :  { %v226_v2 = vpop.f32.mrf.mxu1  ;;  %510 = vmatmul.mubr.bf16.gmra.mxu1 %v249_v60  ;;  %788 = vmatprep.subr.bf16.mxu0 %v1695_v17 }
 0x117   :  { %v227_v3 = vadd.f32 %v226_v2, %v130_v16  ;;  %v243_v4 = vmax.f32 %v225_v63, 0.0  ;;  %789 = vmatpush2.bf16.msra.mxu0 %v1697_v20  ;;  %v840_v16 = vld [vmem:[%s2075_s2] sm:$0xff] }
 0x118   :  { %842 = vperm.xlu0 %1598, %v840_v16  }
 0x119   :  { %v244_v6 = vmax.f32 %v227_v3, 0.0  ;;  %v251_v9 = vpack.c.bf16 %v243_v4, %v241_v7 }
 0x11b   :  { %v252_v8 = vpack.c.bf16 %v244_v6, %v242_v5 }
 0x11d   :  { %519 = vmatprep.mubr.bf16.mxu1 %v252_v8 }
 0x11e   :  { %520 = vmatmul.mubr.bf16.gmra.mxu1 %v251_v9 }
 0x1c6   :  { %v491_v22 = vpop.f32.mrf.mxu1 }
 0x1c7   :  { %v492_v29 = vadd.f32 %v491_v22, %v290_v24  ;;  %v1700_v22 = vld [vmem:[%s2082_s9 + $0x4] ss:$8 sps:$4 sm:$0xff]  }
 0x1c8   :  { %v493_v25 = vpop.f32.mrf.mxu1  ;;  %879 = vmatprep.subr.bf16.mxu0 %v1700_v22 }
 0x1c9   :  { %v494_v27 = vadd.f32 %v493_v25, %v294_v23  ;;  %v530_v36 = vmax.f32 %v492_v29, 0.0  ;;  %v1882_v25 = vmov 0.0   ;;  %v1709_v29 = vld [vmem:[#allocation7 + $0x54] ss:$8 sps:$4 sm:$0xff]  }
 0x1ca   :  { %v495_v26 = vpop.f32.mrf.mxu1 }
 0x1cb   :  { %v496_v28 = vadd.f32 %v495_v26, %v290_v24  ;;  %v531_v34 = vmax.f32 %v494_v27, 0.0  ;;  %v1703_v26 = vld [vmem:[#allocation7 + $0x74] ss:$8 sps:$4 sm:$0xff]   ;;  %v1706_v27 = vld [vmem:[#allocation7 + $0x64] ss:$8 sps:$4 sm:$0xff]  }
 0x1cc   :  { %v497_v30 = vpop.f32.mrf.mxu1  ;;  %1203 = vmatprep.subr.bf16.mxu1 %v1703_v26 }
 0x1cd   :  { %v498_v31 = vadd.f32 %v497_v30, %v294_v23  ;;  %v532_v32 = vmax.f32 %v496_v28, 0.0  ;;  %v1704_v28 = vld [vmem:[#allocation7 + $0x60] ss:$8 sps:$4 sm:$0xff]   ;;  %v1707_v30 = vld [vmem:[#allocation7 + $0x50] ss:$8 sps:$4 sm:$0xff]  }
 0x1ce   :  { %v501_v33 = vpop.f32.mrf.mxu1 }
 0x1cf   :  { %v533_v35 = vmax.f32 %v498_v31, 0.0  ;;  %v546_v39 = vpack.c.bf16 %v532_v32, %v530_v36  ;;  %v502_v43 = vadd.f32 %v501_v33, %v290_v24  ;;  %v1712_v31 = vld [vmem:[#allocation7 + $0x44] ss:$8 sps:$4 sm:$0xff]   ;;  %v1710_v32 = vld [vmem:[#allocation7 + $0x40] ss:$8 sps:$4 sm:$0xff]  }
 0x1d0   :  { %v503_v37 = vpop.f32.mrf.mxu1  ;;  %v1715_v33 = vld [vmem:[#allocation7 + $0x34] ss:$8 sps:$4 sm:$0xff]   ;;  %v1716_v36 = vld [vmem:[#allocation7 + $0x20] ss:$8 sps:$4 sm:$0xff]  }
 0x1d1   :  { %v547_v38 = vpack.c.bf16 %v533_v35, %v531_v34  ;;  %v504_v41 = vadd.f32 %v503_v37, %v294_v23  ;;  %v534_v50 = vmax.f32 %v502_v43, 0.0  ;;  %v1713_v34 = vld [vmem:[#allocation7 + $0x30] ss:$8 sps:$4 sm:$0xff]   ;;  %v1718_v35 = vld [vmem:[#allocation7 + $0x24] ss:$8 sps:$4 sm:$0xff]  }
 0x1d2   :  { %v505_v40 = vpop.f32.mrf.mxu1  ;;  %v1721_v37 = vld [vmem:[#allocation7 + $0x14] ss:$8 sps:$4 sm:$0xff]   ;;  %v1728_v43 = vld [vmem:[#allocation7 + $0xe0] ss:$8 sps:$4 sm:$0xff]  }
 0x1d3   :  { %v506_v42 = vadd.f32 %v505_v40, %v290_v24  ;;  %790 = vmatprep.mubr.bf16.mxu0 %v547_v38  ;;  %v535_v48 = vmax.f32 %v504_v41, 0.0  ;;  %v1719_v38 = vld [vmem:[#allocation7 + $0x10] ss:$8 sps:$4 sm:$0xff]   ;;  %v1722_v40 = vld [vmem:[#allocation7] ss:$8 sps:$4 sm:$0xff]  }
 0x1d4   :  { %v507_v44 = vpop.f32.mrf.mxu1  ;;  %791 = vmatmul.mubr.bf16.vlgmr.msra.gmra.mxu0 %v546_v39  ;;  %v1724_v39 = vld [vmem:[#allocation7 + $0x4] ss:$8 sps:$4 sm:$0xff]   ;;  %v1725_v41 = vld [vmem:[#allocation7 + $0xf0] ss:$8 sps:$4 sm:$0xff]  }
 0x1d5   :  { %v508_v45 = vadd.f32 %v507_v44, %v294_v23  ;;  %v536_v46 = vmax.f32 %v506_v42, 0.0  ;;  %880 = vmatpush1.bf16.msra.mxu0 %v1698_v21  ;;  %v1727_v42 = vld [vmem:[#allocation7 + $0xf4] ss:$8 sps:$4 sm:$0xff]   ;;  %v1730_v44 = vld [vmem:[#allocation7 + $0xe4] ss:$8 sps:$4 sm:$0xff]  }
 0x1d6   :  { %v511_v47 = vpop.f32.mrf.mxu1 }
 0x1d7   :  { %v537_v49 = vmax.f32 %v508_v45, 0.0  ;;  %v548_v53 = vpack.c.bf16 %v536_v46, %v534_v50  ;;  %v512_v57 = vadd.f32 %v511_v47, %v290_v24  ;;  %v1733_v45 = vld [vmem:[#allocation7 + $0xd4] ss:$8 sps:$4 sm:$0xff]   ;;  %v1731_v46 = vld [vmem:[#allocation7 + $0xd0] ss:$8 sps:$4 sm:$0xff]  }
 0x1d8   :  { %v513_v51 = vpop.f32.mrf.mxu1  ;;  %v1736_v47 = vld [vmem:[#allocation7 + $0xc4] ss:$8 sps:$4 sm:$0xff]   ;;  %v1737_v50 = vld [vmem:[#allocation7 + $0xb0] ss:$8 sps:$4 sm:$0xff]  }
 0x1d9   :  { %v549_v52 = vpack.c.bf16 %v537_v49, %v535_v48  ;;  %v514_v55 = vadd.f32 %v513_v51, %v294_v23  ;;  %v538_v1 = vmax.f32 %v512_v57, 0.0  ;;  %v1734_v48 = vld [vmem:[#allocation7 + $0xc0] ss:$8 sps:$4 sm:$0xff]   ;;  %v1739_v49 = vld [vmem:[#allocation7 + $0xb4] ss:$8 sps:$4 sm:$0xff]  }
 0x1da   :  { %v515_v54 = vpop.f32.mrf.mxu1 }
 0x1db   :  { %v516_v56 = vadd.f32 %v515_v54, %v290_v24  ;;  %800 = vmatprep.mubr.bf16.mxu0 %v549_v52  ;;  %v539_v62 = vmax.f32 %v514_v55, 0.0 }
 0x1dc   :  { %v517_v58 = vpop.f32.mrf.mxu1  ;;  %801 = vmatmul.mubr.bf16.gmra.mxu0 %v548_v53 }
 0x1dd   :  { %v518_v59 = vadd.f32 %v517_v58, %v294_v23  ;;  %v540_v60 = vmax.f32 %v516_v56, 0.0 }
 0x1de   :  { %v521_v61 = vpop.f32.mrf.mxu1 }
 0x1df   :  { %v541_v63 = vmax.f32 %v518_v59, 0.0  ;;  %v550_v4 = vpack.c.bf16 %v540_v60, %v538_v1  ;;  %v522_v8 = vadd.f32 %v521_v61, %v290_v24 }
 0x1e0   :  { %v523_v2 = vpop.f32.mrf.mxu1 }
 0x1e1   :  { %v551_v3 = vpack.c.bf16 %v541_v63, %v539_v62  ;;  %v524_v6 = vadd.f32 %v523_v2, %v294_v23  ;;  %v542_v17 = vmax.f32 %v522_v8, 0.0  ;;  %v586_v2 = vld [vmem:[%s2081_s8] sm:$0x3] }
 0x1e2   :  { %v525_v5 = vpop.f32.mrf.mxu1 }
 0x1e3   :  { %v526_v7 = vadd.f32 %v525_v5, %v290_v24  ;;  %810 = vmatprep.mubr.bf16.mxu0 %v551_v3  ;;  %v543_v18 = vmax.f32 %v524_v6, 0.0  ;;  %v834_v5 = vand.u32 127, %v123_v10  ;;  %v835_v6 = vmul.u32 8, %v2016_v11  ;;  %v843_v10 = vpop.permute.xlu0 %842 }
 0x1e4   :  { %v527_v9 = vpop.f32.mrf.mxu1  ;;  %811 = vmatmul.mubr.bf16.gmra.mxu0 %v550_v4  ;;  %v595_v4 = vrot.slane %v586_v2, %v2019_v12 }
 0x1e5   :  { %v528_v14 = vadd.f32 %v527_v9, %v294_v23  ;;  %v544_v15 = vmax.f32 %v526_v7, 0.0  ;;  %v848_v23 = vld [vmem:[%s2073_s0] sm:$0xff]  ;;  %v591_v7 = vrot.slane %v586_v2, %v2022_v13  ;;  %v1762_v2 = vld [vmem:[#allocation8 + $0x8] sm:$0xff]  }
 0x1e6   :  { %v849_v24 = vpack.c.bf16 %v848_v23, %v848_v23 }
 0x1e7   :  { %v545_v19 = vmax.f32 %v528_v14, 0.0  ;;  %v552_v16 = vpack.c.bf16 %v544_v15, %v542_v17 }
 0x1e9   :  { %v553_v20 = vpack.c.bf16 %v545_v19, %v543_v18  ;;  %v836_v18 = vsub.s32 %v834_v5, %v835_v6  ;;  %v1031_v5 = vld [vmem:[%s2085_s12] sm:$0x3]  ;;  %s1883_s12 = smov [#allocation10]  }
 0x1ea   :  { %v1036_v6 = vrot.slane %v1031_v5, %v2022_v13  ;;  %s1430_s20 = sshll.u32 %s1883_s12, 4  ;;  %s1431_s20 = int_to_ptr.vmem [resolvable:$true] %s1430_s20 }
 0x1eb   :  { %820 = vmatprep.mubr.bf16.mxu0 %v553_v20  ;;  %vm837_vm1 = vcmp.ge.s32.totalorder %v836_v18, 0  ;;  %vm838_vm2 = vcmp.lt.s32.totalorder %v836_v18, 8  ;;  %vm844_vm4 = vcmp.lt.s32.totalorder %v836_v18, %v843_v10  ;;  %s1845_s7 = scalar_lea.vmem %s1431_s20, 128  ;;  %p1850_p7 = scmp.lt.s32.totalorder %s1431_s20, %s1431_s20 }
 0x1ec   :  { %821 = vmatmul.mubr.bf16.gmra.mxu0 %v552_v16  ;;  %vm839_vm3 = vmand %vm837_vm1, %vm838_vm2  ;;  %p1846_p6 = scmp.ne.s32.totalorder %s1431_s20, %s1845_s7  ;;  %p1851_p8 = scmp.lt.s32.totalorder %s1845_s7, %s1845_s7 }
 0x1ed   :  { %897 = vmatprep.mubr.bf16.mxu0 %v1881_v0  ;;  %v1701_v0 = vld [vmem:[#allocation7 + $0x70] ss:$8 sps:$4 sm:$0xff]   ;;  %vm845_vm5 = vmand %vm839_vm3, %vm844_vm4 }
 0x1ee   :  { %1204 = vmatpush1.bf16.msra.mxu1 %v1701_v0  ;;  %p1852_p9 = por %p1851_p8, %p1850_p7 }
 0x1ef   :  { %1205 = vmatprep.subr.bf16.mxu1 %v1706_v27 }
 0x1f0   :  { %p1853_p10 = pnand %p1852_p9, %p1846_p6 }
 0x1f2   :  { %1206 = vmatpush1.bf16.msra.mxu1 %v1704_v28 }
 0x1f3   :  { %1207 = vmatprep.subr.bf16.mxu1 %v1709_v29  ;;  %v1511_v29 = vsel %vm845_vm5, 1.0, %v1882_v25 }
 0x1f4   :  { %1514 = vmatmul.mubr.msk.bf16.vlgmr.msra.gmra.mxu0 %vm143_vm0, %v849_v24 }
 0x1f5   :  { %974 = vmatprep.mubr.f32.mxu0 %v1882_v25  ;;  %v1749_v25 = vld [vmem:[#allocation8 + $0x78] sm:$0xff]  }
 0x1f6   :  { %1208 = vmatpush1.bf16.msra.mxu1 %v1707_v30 }
 0x1f7   :  { %1209 = vmatprep.subr.bf16.mxu1 %v1712_v31 }
 0x1fa   :  { %1210 = vmatpush1.bf16.msra.mxu1 %v1710_v32 }
 0x1fb   :  { %1211 = vmatprep.subr.bf16.mxu1 %v1715_v33 }
 0x1fe   :  { %1212 = vmatpush1.bf16.msra.mxu1 %v1713_v34  ;;  %v1742_v34 = vld [vmem:[#allocation7 + $0xa4] ss:$8 sps:$4 sm:$0xff]  }
 0x1ff   :  { %1213 = vmatprep.subr.bf16.mxu1 %v1718_v35  ;;  %v1740_v35 = vld [vmem:[#allocation7 + $0xa0] ss:$8 sps:$4 sm:$0xff]  }
 0x202   :  { %1214 = vmatpush1.bf16.msra.mxu1 %v1716_v36  ;;  %v1745_v36 = vld [vmem:[#allocation7 + $0x94] ss:$8 sps:$4 sm:$0xff]  }
 0x203   :  { %1215 = vmatprep.subr.bf16.mxu1 %v1721_v37  ;;  %v1743_v37 = vld [vmem:[#allocation7 + $0x90] ss:$8 sps:$4 sm:$0xff]  }
 0x206   :  { %1216 = vmatpush1.bf16.msra.mxu1 %v1719_v38  ;;  %v1748_v38 = vld [vmem:[#allocation7 + $0x84] ss:$8 sps:$4 sm:$0xff]  }
 0x207   :  { %1217 = vmatprep.subr.bf16.mxu1 %v1724_v39  ;;  %v1746_v39 = vld [vmem:[#allocation7 + $0x80] ss:$8 sps:$4 sm:$0xff]  }
 0x20a   :  { %1218 = vmatpush1.bf16.msra.mxu1 %v1722_v40  ;;  %v1750_v40 = vld [vmem:[#allocation8 + $0x38] sm:$0xff]  }
 0x20b   :  { %1219 = vmatprep.subr.bf16.mxu1 %v1727_v42  ;;  %v1752_v42 = vld [vmem:[#allocation8 + $0x30] sm:$0xff]  }
 0x20e   :  { %1220 = vmatpush2.bf16.msra.mxu1 %v1725_v41  ;;  %v1751_v41 = vld [vmem:[#allocation8 + $0x70] sm:$0xff]  }
 0x20f   :  { %1221 = vmatprep.subr.bf16.mxu1 %v1730_v44  ;;  %v1754_v44 = vld [vmem:[#allocation8 + $0x28] sm:$0xff]  }
 0x212   :  { %1222 = vmatpush2.bf16.msra.mxu1 %v1728_v43  ;;  %v1753_v43 = vld [vmem:[#allocation8 + $0x68] sm:$0xff]  }
 0x213   :  { %1223 = vmatprep.subr.bf16.mxu1 %v1733_v45  ;;  %v1755_v45 = vld [vmem:[#allocation8 + $0x60] sm:$0xff]  }
 0x216   :  { %1224 = vmatpush2.bf16.msra.mxu1 %v1731_v46  ;;  %v1756_v46 = vld [vmem:[#allocation8 + $0x20] sm:$0xff]  }
 0x217   :  { %1225 = vmatprep.subr.bf16.mxu1 %v1736_v47  ;;  %v1757_v47 = vld [vmem:[#allocation8 + $0x58] sm:$0xff]  }
 0x21a   :  { %1226 = vmatpush2.bf16.msra.mxu1 %v1734_v48  ;;  %v1758_v48 = vld [vmem:[#allocation8 + $0x18] sm:$0xff]  }
 0x21b   :  { %1227 = vmatprep.subr.bf16.mxu1 %v1739_v49  ;;  %v1759_v49 = vld [vmem:[#allocation8 + $0x50] sm:$0xff]  }
 0x21e   :  { %1228 = vmatpush2.bf16.msra.mxu1 %v1737_v50  ;;  %v1760_v50 = vld [vmem:[#allocation8 + $0x10] sm:$0xff]  }
 0x21f   :  { %1229 = vmatprep.subr.bf16.mxu1 %v1742_v34 }
 0x222   :  { %1230 = vmatpush2.bf16.msra.mxu1 %v1740_v35 }
 0x223   :  { %1231 = vmatprep.subr.bf16.mxu1 %v1745_v36 }
 0x226   :  { %1232 = vmatpush2.bf16.msra.mxu1 %v1743_v37 }
 0x227   :  { %1233 = vmatprep.subr.bf16.mxu1 %v1748_v38 }
 0x22a   :  { %1234 = vmatpush2.bf16.msra.mxu1 %v1746_v39 }
 0x294   :  { %v792_v51 = vpop.f32.mrf.mxu0 }
 0x295   :  { %v793_v28 = vadd.f32 %v792_v51, %v591_v7  ;;  %v981_v51 = vld [vmem:[%s2083_s10] sm:$0x3] }
 0x296   :  { %v794_v52 = vpop.f32.mrf.mxu0 }
 0x297   :  { %v795_v27 = vadd.f32 %v794_v52, %v595_v4  ;;  %v986_v52 = vrot.slane %v981_v51, %v2022_v13 }
 0x298   :  { %v796_v53 = vpop.f32.mrf.mxu0 }
 0x299   :  { %v797_v26 = vadd.f32 %v796_v53, %v591_v7 }
 0x29a   :  { %v798_v54 = vpop.f32.mrf.mxu0 }
 0x29b   :  { %v799_v0 = vadd.f32 %v798_v54, %v595_v4 }
 0x29c   :  { %v802_v55 = vpop.f32.mrf.mxu0 }
 0x29d   :  { %v803_v24 = vadd.f32 %v802_v55, %v591_v7  ;;  %v990_v55 = vrot.slane %v981_v51, %v2019_v12 }
 0x29e   :  { %v804_v56 = vpop.f32.mrf.mxu0 }
 0x29f   :  { %v805_v23 = vadd.f32 %v804_v56, %v595_v4 }
 0x2a0   :  { %v806_v57 = vpop.f32.mrf.mxu0 }
 0x2a1   :  { %v807_v22 = vadd.f32 %v806_v57, %v591_v7 }
 0x2a2   :  { %v808_v58 = vpop.f32.mrf.mxu0 }
 0x2a3   :  { %v809_v21 = vadd.f32 %v808_v58, %v595_v4 }
 0x2a4   :  { %v812_v59 = vpop.f32.mrf.mxu0 }
 0x2a5   :  { %v813_v11 = vadd.f32 %v812_v59, %v591_v7 }
 0x2a6   :  { %v814_v60 = vpop.f32.mrf.mxu0 }
 0x2a7   :  { %v815_v16 = vadd.f32 %v814_v60, %v595_v4 }
 0x2a8   :  { %v816_v61 = vpop.f32.mrf.mxu0 }
 0x2a9   :  { %v817_v20 = vadd.f32 %v816_v61, %v591_v7 }
 0x2aa   :  { %v818_v62 = vpop.f32.mrf.mxu0 }
 0x2ab   :  { %v819_v17 = vadd.f32 %v818_v62, %v595_v4 }
 0x2ac   :  { %v822_v63 = vpop.f32.mrf.mxu0 }
 0x2ad   :  { %v823_v19 = vadd.f32 %v822_v63, %v591_v7 }
 0x2ae   :  { %v824_v1 = vpop.f32.mrf.mxu0 }
 0x2af   :  { %v825_v15 = vadd.f32 %v824_v1, %v595_v4  ;;  %v1761_v1 = vld [vmem:[#allocation8 + $0x48] sm:$0xff]  }
 0x2b0   :  { %v826_v3 = vpop.f32.mrf.mxu0 }
 0x2b1   :  { %v827_v14 = vadd.f32 %v826_v3, %v591_v7  ;;  %v1763_v3 = vld [vmem:[#allocation8 + $0x40] sm:$0xff]   ;;  %v1040_v7 = vrot.slane %v1031_v5, %v2019_v12 }
 0x2b2   :  { %v828_v8 = vpop.f32.mrf.mxu0 }
 0x2b3   :  { %v829_v9 = vadd.f32 %v828_v8, %v595_v4  ;;  %v1764_v4 = vld [vmem:[#allocation8] sm:$0xff]  }
 0x2b4   :  { %v899_v30 = vpop.f32.mrf.mxu0 }
 0x2b5   :  { %926 = vmatprep.subr.mxu0 %v829_v9 }
 0x2b6   :  { %927 = vmatpush1.msra.mxu0 %v827_v14  ;;  %v901_v31 = vpop.f32.mrf.mxu0 }
 0x2b7   :  { %928 = vmatprep.subr.mxu0 %v825_v15 }
 0x2b8   :  { %929 = vmatpush1.msra.mxu0 %v823_v19  ;;  %v903_v32 = vpop.f32.mrf.mxu0 }
 0x2b9   :  { %930 = vmatprep.subr.mxu0 %v819_v17 }
 0x2ba   :  { %931 = vmatpush1.msra.mxu0 %v817_v20  ;;  %v904_v33 = vpop.f32.mrf.mxu0 }
 0x2bb   :  { %932 = vmatprep.subr.mxu0 %v815_v16 }
 0x2bc   :  { %933 = vmatpush1.msra.mxu0 %v813_v11 }
 0x2bd   :  { %934 = vmatprep.subr.mxu0 %v809_v21  ;;  %v1548_v21 = vld [vmem:[%s2087_s14] ss:$0 sm:$0xff] }
 0x2be   :  { %935 = vmatpush1.msra.mxu0 %v807_v22 }
 0x2bf   :  { %936 = vmatprep.subr.mxu0 %v805_v23 }
 0x2c0   :  { %937 = vmatpush1.msra.mxu0 %v803_v24 }
 0x2c1   :  { %938 = vmatprep.subr.mxu0 %v799_v0 }
 0x2c2   :  { %939 = vmatpush1.msra.mxu0 %v797_v26 }
 0x2c3   :  { %940 = vmatprep.subr.mxu0 %v795_v27 }
 0x2c4   :  { %941 = vmatpush1.msra.mxu0 %v793_v28 }
 0x2c5   :  { %1515 = vmatmul.mubr.msk.f32.vlgmr.msra.gmra.mxu0 %vm906_vm6, %v1511_v29  ;;  %1565 = vmatprep.subr.bf16.mxu0 %v1749_v25 }
 0x2c6   :  { %1566 = vmatpush3.bf16.msra.mxu0 %v1750_v40 }
 0x2c7   :  { %1567 = vmatprep.subr.bf16.mxu0 %v1751_v41 }
 0x2ca   :  { %1568 = vmatpush3.bf16.msra.mxu0 %v1752_v42 }
 0x2cb   :  { %1569 = vmatprep.subr.bf16.mxu0 %v1753_v43 }
 0x2ce   :  { %1570 = vmatpush3.bf16.msra.mxu0 %v1754_v44 }
 0x2cf   :  { %1571 = vmatprep.subr.bf16.mxu0 %v1755_v45 }
 0x2d2   :  { %1572 = vmatpush3.bf16.msra.mxu0 %v1756_v46 }
 0x2d3   :  { %1573 = vmatprep.subr.bf16.mxu0 %v1757_v47 }
 0x2d6   :  { %1574 = vmatpush3.bf16.msra.mxu0 %v1758_v48 }
 0x2d7   :  { %1575 = vmatprep.subr.bf16.mxu0 %v1759_v49 }
 0x2da   :  { %1576 = vmatpush3.bf16.msra.mxu0 %v1760_v50 }
 0x2db   :  { %1577 = vmatprep.subr.bf16.mxu0 %v1761_v1 }
 0x2de   :  { %1578 = vmatpush3.bf16.msra.mxu0 %v1762_v2 }
 0x2df   :  { %1579 = vmatprep.subr.bf16.mxu0 %v1763_v3 }
 0x2e2   :  { %1580 = vmatpush3.bf16.msra.mxu0 %v1764_v4 }
 0x385   :  { %v976_v53 = vpop.f32.mrf.mxu0 }
 0x386   :  { %v977_v54 = vadd.f32 %v976_v53, %v899_v30 }
 0x387   :  { %v978_v56 = vpop.f32.mrf.mxu0 }
 0x388   :  { %v993_v57 = vadd.f32 %v986_v52, %v977_v54  ;;  %v979_v58 = vadd.f32 %v978_v56, %v901_v31 }
 0x38a   :  { %v994_v59 = vadd.f32 %v990_v55, %v979_v58  ;;  %v995_v60 = vmax.f32 %v993_v57, 0.0 }
 0x38c   :  { %v996_v61 = vmax.f32 %v994_v59, 0.0  ;;  %v997_v63 = vpack.c.bf16 %v995_v60, %v995_v60 }
 0x38e   :  { %v998_v62 = vpack.c.bf16 %v996_v61, %v996_v61 }
 0x390   :  { %1235 = vmatprep.mubr.bf16.mxu1 %v998_v62 }
 0x391   :  { %1236 = vmatmul.mubr.bf16.vlgmr.msra.gmra.mxu1 %v997_v63 }
 0x451   :  { %v1237_v8 = vpop.f32.mrf.mxu1 }
 0x452   :  { %v1238_v9 = vadd.f32 %v1237_v8, %v1036_v6 }
 0x453   :  { %v1239_v14 = vpop.f32.mrf.mxu1 }
 0x454   :  { %v1240_v15 = vadd.f32 %v1239_v14, %v1040_v7  ;;  %v1244_v18 = vmax.f32 %v1238_v9, 0.0 }
 0x455   :  { %v1241_v19 = vpop.f32.mrf.mxu1 }
 0x456   :  { %v1245_v17 = vmax.f32 %v1240_v15, 0.0  ;;  %v1246_v10 = vpack.c.bf16 %v1244_v18, %v1244_v18 }
 0x457   :  { %v1242_v20 = vpop.f32.mrf.mxu1 }
 0x458   :  { %v1247_v16 = vpack.c.bf16 %v1245_v17, %v1245_v17 }
 0x45a   :  { %1415 = vmatprep.mubr.bf16.mxu0 %v1247_v16 }
 0x45b   :  { %1416 = vmatmul.mubr.bf16.vlgmr.msra.gmra.mxu0 %v1246_v10 }
 0x51b   :  { %v1581_v11 = vpop.f32.mrf.mxu0 }
 0x51d   :  { %v1582_v13 = vpop.f32.mrf.mxu0 }
 0x51e   :  { %v1583_v12 = vadd.f32 %v1582_v13, %v1581_v11 }
 0x51f   :  { %v1584_v22 = vpop.f32.mrf.mxu0 }
 0x520   :  { %v1418_v23 = vadd.f32 %v1583_v12, %v1548_v21 }
 0x521   :  { %v1585_v24 = vpop.f32.mrf.mxu0 }
 0x522   :  { %1423 = vst [vmem:[#allocation10] sm:$0xff] %v1418_v23 }
 0x523   :  { %1856 = shalt.err (!%p1853_p10)
}
 0x524   :  { %1433 = dma.vmem_to_hbm [thread:$0]  %s1431_s20, 128, %s2088_s15, [#allocation4]  }
 0x525   :  { %1871 = dma.done.wait [#allocation4], 128  }
 0x526   :  { %1872 = vsyncadd [#allocation4], 4294967168 }
 0x527   :  { %1437 = vsyncpa [#allocation3], 1 }
 0x528   :  { %1438 = vsyncpa [#allocation6], 1 }
 0x529   :  { %1439 = vsyncpa [#allocation9], 1 }
 0x52a   :  { %1440 = vsyncpa [#allocation4], 1 }

</bundles_post_ra>
